<compile_context>
chip_gen: v7x
topology: tpu7x:2x2x1
jax: 0.10.0
libtpu: 0.0.40
codegen_flags: <defaults>
</compile_context>

<pallas_src>
import functools
import math

import jax
import jax.numpy as jnp
from jax.experimental import pallas as pl
from jax.experimental.pallas import tpu as pltpu


class Opt:
    """Mirror of the fields of `opt` that bsc_channel reads."""

    def __init__(self, enc_type="soft_hard", sample_type="gumbel_softmax_hard",
                 temp=0.5, ber=0.1):
        self.enc_type = enc_type
        self.sample_type = sample_type
        self.temp = temp
        self.ber = ber


_ENC_TYPES = ("prob", "hard", "soft", "soft_hard")
_SAMPLE_TYPES = ("st", "gumbel_softmax", "gumbel_softmax_hard")


def _make_bsc_kernel(enc_type, sample_type, temp, ber):
    if enc_type not in _ENC_TYPES:
        raise ValueError(f"unknown enc_type {enc_type!r}")
    if sample_type not in _SAMPLE_TYPES:
        raise ValueError(f"unknown sample_type {sample_type!r}")

    temp = float(temp)
    ber = float(ber)
    eps = float(jnp.finfo(jnp.float32).eps)  # torch clamp_probs uses finfo.eps

    hard_enc = enc_type in ("hard", "soft_hard")
    # For hard encoders out_prob takes only the two values {ber, 1-ber}, so
    # logit(out_prob) is a compile-time constant +/- log((1-ber)/ber).
    const_log_odds = None
    if hard_enc and (eps < ber < 1.0 - eps):
        const_log_odds = math.log((1.0 - ber) / ber)

    def _clamp_probs(p):
        return jnp.clip(p, eps, 1.0 - eps)

    def kernel(x_ref, u_ref, o_ref):
        x = x_ref[...].astype(jnp.float32)
        u = u_ref[...]

        # ----- encoder quantization (forward value) -----
        if enc_type == "prob":
            pass
        elif hard_enc:
            # 'hard':      x + (1[x>0.5] - x).detach()          -> 1[x>0.5]
            # 'soft_hard': sigmoid((2x-1)/T) thresholded at 0.5  -> 1[x>0.5]
            x = (x > 0.5).astype(jnp.float32)
        else:  # 'soft'
            x = jax.nn.sigmoid((2.0 * x - 1.0) / temp)

        # ----- BSC flip probability -----
        out_prob = ber + (1.0 - 2.0 * ber) * x

        # ----- channel sampling (forward value) -----
        if sample_type == "st":
            # forward value of out_prob + (bernoulli(p) - out_prob).detach()
            dec_in = (u < out_prob).astype(jnp.float32)
        elif sample_type == "gumbel_softmax":
            probs = _clamp_probs(out_prob)
            uniforms = _clamp_probs(u)
            logit_u = jnp.log(uniforms) - jnp.log1p(-uniforms)
            if const_log_odds is not None:
                logit_p = jnp.where(x > 0.5, const_log_odds, -const_log_odds)
            else:
                logit_p = jnp.log(probs) - jnp.log1p(-probs)
            dec_in = jax.nn.sigmoid((logit_u + logit_p) / temp)
        else:  # 'gumbel_softmax_hard'
            # Pure compare: no transcendentals on the default hot path.
            probs = _clamp_probs(out_prob)
            uniforms = _clamp_probs(u)
            dec_in = (uniforms > 1.0 - probs).astype(jnp.float32)

        o_ref[...] = dec_in.astype(o_ref.dtype)

    return kernel


def _choose_lanes(total):
    """Widest lane count (multiple of 128) that divides the element count."""
    for cand in (2048, 1024, 512, 256, 128):
        if total % cand == 0:
            return cand
    return 128  # fall back; flat array will be padded by < 128 elements


@functools.partial(jax.jit, static_argnames=("enc_type", "sample_type", "temp", "ber"))
def bsc_channel_forward(x, key, *, enc_type, sample_type, temp, ber):
    """x: float NCHW tensor. key: jax.random PRNG key for the channel noise."""
    orig_shape = x.shape
    orig_dtype = x.dtype
    total = x.size

    lanes = _choose_lanes(total)
    xf = x.reshape(-1).astype(jnp.float32)
    pad = (-total) % lanes
    if pad:
        # rare fallback (element count not a multiple of 128): pad < 128 elems
        xf = jnp.pad(xf, (0, pad))
    rows = (total + pad) // lanes
    x2d = xf.reshape(rows, lanes)

    # Channel randomness, generated once for the whole tensor (each tile sees
    # its own slice, so no per-tile seed bookkeeping is needed).
    u2d = jax.random.uniform(key, (rows, lanes), dtype=jnp.float32)

    # ~2 MiB f32 tiles: big enough for ~85% of HBM roofline, small enough that
    # (x + u + out) * 2 pipeline buffers = 12 MiB fits v5e's 16 MiB scoped VMEM
    # default and v7x's 64 MiB physical VMEM with plenty of headroom.
    target_block_bytes = 2 * 1024 * 1024
    tr = max(8, target_block_bytes // (lanes * 4))
    tr = min(tr, ((rows + 7) // 8) * 8)        # don't over-allocate for tiny inputs
    tr = ((tr + 7) // 8) * 8                   # sublane-aligned block rows
    grid = (pl.cdiv(rows, tr),)                # partial last tile is fine:
                                               # garbage rows are masked on write

    kernel = _make_bsc_kernel(enc_type, sample_type, temp, ber)

    out2d = pl.pallas_call(
        kernel,
        out_shape=jax.ShapeDtypeStruct((rows, lanes), jnp.float32),
        grid=grid,
        in_specs=[
            pl.BlockSpec((tr, lanes), lambda i: (i, 0)),
            pl.BlockSpec((tr, lanes), lambda i: (i, 0)),
        ],
        out_specs=pl.BlockSpec((tr, lanes), lambda i: (i, 0)),
        compiler_params=pltpu.CompilerParams(
            dimension_semantics=("parallel",),  # lets v7x shard tiles over 2 TCs
        ),
    )(x2d, u2d)

    out = out2d.reshape(-1)
    if pad:
        out = out[:total]
    return out.reshape(orig_shape).astype(orig_dtype)


if __name__ == "__main__":
    key = jax.random.PRNGKey(0)
    k_x, k_noise = jax.random.split(key)

    # small NCHW input consistent with an encoder feature map
    x = jax.random.uniform(k_x, (2, 4, 16, 16), dtype=jnp.float32)

    opt = Opt(enc_type="soft_hard", sample_type="gumbel_softmax_hard",
              temp=0.5, ber=0.1)

    out = bsc_channel_forward(
        x, k_noise,
        enc_type=opt.enc_type, sample_type=opt.sample_type,
        temp=opt.temp, ber=opt.ber,
    )
    out = jax.block_until_ready(out)

    assert out.shape == x.shape and out.dtype == jnp.float32
    # hard sampler must produce only {0, 1}
    assert bool(jnp.all((out == 0.0) | (out == 1.0)))
    print("KERNEL_OK")
</pallas_src>

<mosaic_0001>
module attributes {stable_mosaic.version = 11 : i64} {
  func.func @kernel(%arg0: i32, %arg1: memref<8x2048xf32, #tpu.memory_space<vmem>>, %arg2: memref<8x2048xf32, #tpu.memory_space<vmem>>, %arg3: memref<8x2048xf32, #tpu.memory_space<vmem>>) attributes {dimension_semantics = [#tpu.dimension_semantics<parallel>], iteration_bounds = array<i64: 1>, scalar_prefetch = 0 : i64, scratch_operands = 0 : i64, tpu.core_type = #tpu.core_type<tc>, window_params = [{transform_indices = @transform_0, window_bounds = array<i64: 8, 2048>}, {transform_indices = @transform_1, window_bounds = array<i64: 8, 2048>}, {transform_indices = @transform_2, window_bounds = array<i64: 8, 2048>}]} {
    %c0 = arith.constant 0 : index
    %c0_0 = arith.constant 0 : index
    %0 = vector.load %arg1[%c0, %c0_0] : memref<8x2048xf32, #tpu.memory_space<vmem>>, vector<8x2048xf32>
    %c0_1 = arith.constant 0 : index
    %c0_2 = arith.constant 0 : index
    %1 = vector.load %arg2[%c0_1, %c0_2] : memref<8x2048xf32, #tpu.memory_space<vmem>>, vector<8x2048xf32>
    %cst = arith.constant 5.000000e-01 : f32
    %2 = vector.broadcast %cst : f32 to vector<8x2048xf32>
    %3 = arith.cmpf ogt, %0, %2 : vector<8x2048xf32>
    %4 = arith.extui %3 : vector<8x2048xi1> to vector<8x2048xi32>
    %5 = arith.sitofp %4 : vector<8x2048xi32> to vector<8x2048xf32>
    %cst_3 = arith.constant 8.000000e-01 : f32
    %6 = vector.broadcast %cst_3 : f32 to vector<8x2048xf32>
    %7 = arith.mulf %6, %5 : vector<8x2048xf32>
    %cst_4 = arith.constant 1.000000e-01 : f32
    %8 = vector.broadcast %cst_4 : f32 to vector<8x2048xf32>
    %9 = arith.addf %8, %7 : vector<8x2048xf32>
    %cst_5 = arith.constant 1.1920929E-7 : f32
    %cst_6 = arith.constant 0.99999988 : f32
    %10 = vector.broadcast %cst_5 : f32 to vector<8x2048xf32>
    %11 = arith.maximumf %10, %9 : vector<8x2048xf32>
    %12 = vector.broadcast %cst_6 : f32 to vector<8x2048xf32>
    %13 = arith.minimumf %12, %11 : vector<8x2048xf32>
    %cst_7 = arith.constant 1.1920929E-7 : f32
    %cst_8 = arith.constant 0.99999988 : f32
    %14 = vector.broadcast %cst_7 : f32 to vector<8x2048xf32>
    %15 = arith.maximumf %14, %1 : vector<8x2048xf32>
    %16 = vector.broadcast %cst_8 : f32 to vector<8x2048xf32>
    %17 = arith.minimumf %16, %15 : vector<8x2048xf32>
    %cst_9 = arith.constant 1.000000e+00 : f32
    %18 = vector.broadcast %cst_9 : f32 to vector<8x2048xf32>
    %19 = arith.subf %18, %13 : vector<8x2048xf32>
    %20 = arith.cmpf ogt, %17, %19 : vector<8x2048xf32>
    %21 = arith.extui %20 : vector<8x2048xi1> to vector<8x2048xi32>
    %22 = arith.sitofp %21 : vector<8x2048xi32> to vector<8x2048xf32>
    %c0_10 = arith.constant 0 : index
    %c0_11 = arith.constant 0 : index
    %23 = vector.load %arg3[%c0_10, %c0_11] : memref<8x2048xf32, #tpu.memory_space<vmem>>, vector<8x2048xf32>
    tpu.vector_store %arg3[%c0_10, %c0_11], %22 {strides = array<i32>} : memref<8x2048xf32, #tpu.memory_space<vmem>>, vector<8x2048xf32>,
    return
  }
  func.func @transform_0(%arg0: i32) -> (i32, i32) {
    %c0_i32 = arith.constant 0 : i32
    %c0_i32_0 = arith.constant 0 : i32
    return %arg0, %c0_i32 : i32, i32
  }
  func.func @transform_1(%arg0: i32) -> (i32, i32) {
    %c0_i32 = arith.constant 0 : i32
    %c0_i32_0 = arith.constant 0 : i32
    return %arg0, %c0_i32 : i32, i32
  }
  func.func @transform_2(%arg0: i32) -> (i32, i32) {
    %c0_i32 = arith.constant 0 : i32
    %c0_i32_0 = arith.constant 0 : i32
    return %arg0, %c0_i32 : i32, i32
  }
}

</mosaic_0001>

<bundles_post_ra>
// kernel: bsc_channel_forward.1
= control target key start
LH: loop header
LB: loop body
LE: loop exit
PB: predicated region body
PF: predicated region fallthrough
CT: control target
= control target key end

     0   :  { %v327_v3 = vmov 0.0   ;;  %s361_s0 = inlined_call_operand.vmem [shape: f32[1,2048], index: 0, kind: input, shape index: {}]   ;;  %s362_s1 = inlined_call_operand.vmem [shape: f32[1,2048], index: 1, kind: input, shape index: {}]   ;;  %s363_s2 = inlined_call_operand.vmem [shape: f32[1,2048], index: 2, kind: output, shape index: {}]  }
   0x1   :  { %v11_v0 = vld [vmem:[%s361_s0] sm:$0xff]  ;;  %v12_v1 = vld [vmem:[%s361_s0 + $0x8] sm:$0xff] }
   0x2   :  { %v27_v2 = vld [vmem:[%s362_s1] sm:$0xff]  ;;  %vm43_vm0 = vcmp.gt.f32.partialorder %v11_v0, 0.5  ;;  %vm44_vm1 = vcmp.gt.f32.partialorder %v12_v1, 0.5  ;;  %v28_v5 = vld [vmem:[%s362_s1 + $0x8] sm:$0xff] }
   0x3   :  { %v294_v4 = vsel %vm43_vm0, 1.0, %v327_v3  ;;  %v295_v6 = vsel %vm44_vm1, 1.0, %v327_v3  ;;  %v155_v9 = vmax.f32 %v27_v2, 1.1920929e-07  ;;  %v156_v12 = vmax.f32 %v28_v5, 1.1920929e-07 }
   0x4   :  { %v91_v7 = vmul.f32 0.8, %v294_v4  ;;  %v92_v8 = vmul.f32 0.8, %v295_v6 }
   0x5   :  { %v171_v15 = vmin.f32 %v155_v9, 0.9999999  ;;  %v172_v18 = vmin.f32 %v156_v12, 0.9999999 }
   0x6   :  { %v107_v10 = vadd.f32 0.1, %v91_v7  ;;  %v108_v11 = vadd.f32 0.1, %v92_v8 }
   0x8   :  { %v123_v13 = vmax.f32 %v107_v10, 1.1920929e-07  ;;  %v124_v14 = vmax.f32 %v108_v11, 1.1920929e-07 }
   0xa   :  { %v139_v16 = vmin.f32 %v123_v13, 0.9999999  ;;  %v140_v17 = vmin.f32 %v124_v14, 0.9999999 }
   0xc   :  { %v187_v19 = vsub.f32 1.0, %v139_v16  ;;  %v188_v20 = vsub.f32 1.0, %v140_v17 }
   0xe   :  { %vm203_vm2 = vcmp.gt.f32.partialorder %v171_v15, %v187_v19  ;;  %vm204_vm3 = vcmp.gt.f32.partialorder %v172_v18, %v188_v20 }
   0xf   :  { %v310_v21 = vsel %vm203_vm2, 1.0, %v327_v3  ;;  %v311_v22 = vsel %vm204_vm3, 1.0, %v327_v3 }
  0x10   :  { %282 = vst [vmem:[%s363_s2] sm:$0xff] %v310_v21  ;;  %284 = vst [vmem:[%s363_s2 + $0x8] sm:$0xff] %v311_v22 }

</bundles_post_ra>
